<compile_context>
chip_gen: v7x
topology: tpu7x:2x2x1
jax: 0.10.0
libtpu: 0.0.40
codegen_flags: <defaults>
</compile_context>

<pallas_src>
import functools

import jax
import jax.numpy as jnp
from jax import lax
from jax.experimental import pallas as pl
from jax.experimental.pallas import tpu as pltpu

BN_EPS = 1e-5
LANE = 128
SUBLANE = 8
TILE_M_MAX = 2048                       # max rows (= N*Ho*Wo) per grid step
TILE_K_MAX = 2048                       # max K (= KH*KW*Cin_pad) per grid step
VMEM_BUDGET_BYTES = 20 * 1024 * 1024    # streaming budget used to size tiles
VMEM_LIMIT_BYTES = 32 * 1024 * 1024     # explicit scoped-VMEM limit (safe on v5e/v6e/v7x)


def _round_up(x, m):
    return (x + m - 1) // m * m


def _cdiv(a, b):
    return (a + b - 1) // b


# ---------------------------------------------------------------------------
# Pass 1: conv-as-matmul (bf16 MXU operands, f32 accumulator) + per-row-tile
#         BN partial sums / sums-of-squares.  No bias add (cancelled by BN or
#         folded into the pass-2 shift), so zero pad-rows contribute exactly 0
#         to the statistics and no masking is needed.
# ---------------------------------------------------------------------------
def _conv_stats_kernel(patches_ref, w_ref, y_ref, sum_ref, sq_ref, acc_ref):
    k = pl.program_id(1)

    @pl.when(k == 0)
    def _():
        acc_ref[...] = jnp.zeros_like(acc_ref)

    acc_ref[...] += jnp.dot(patches_ref[...], w_ref[...],
                            preferred_element_type=jnp.float32)

    @pl.when(k == pl.num_programs(1) - 1)
    def _():
        y = acc_ref[...]                              # (tile_m, c_pad) f32
        y_ref[...] = y.astype(y_ref.dtype)            # bf16 intermediate to HBM
        s = jnp.sum(y, axis=0, keepdims=True)         # (1, c_pad) f32
        sq = jnp.sum(y * y, axis=0, keepdims=True)
        sum_ref[...] = s[None]                        # (1, 1, c_pad)
        sq_ref[...] = sq[None]


# ---------------------------------------------------------------------------
# Pass 2: folded batch-norm affine (f32 math) + ReLU / LeakyReLU; the only
#         narrow-precision step is the final store.
# ---------------------------------------------------------------------------
def _bn_act_kernel(y_ref, scale_ref, shift_ref, out_ref, *, leaky_slope):
    y = y_ref[...].astype(jnp.float32) * scale_ref[...] + shift_ref[...]
    if leaky_slope == 0.0:
        y = jnp.maximum(y, 0.0)
    else:
        y = jnp.where(y > 0, y, leaky_slope * y)
    out_ref[...] = y.astype(out_ref.dtype)


def _im2col_bf16(x_nchw, kh, kw, stride, pad, cin_pad):
    """x [N,Cin,H,W] -> bf16 patches [N*Ho*Wo, KH*KW*Cin_pad] (tap order kh,kw,c).

    cast->NHWC->pad->strided slices->concat is one XLA fusion producing the
    lane-padded bf16 patches buffer directly (no separate f32 patches tensor
    and no second zero-padding copy).
    """
    n, cin, h, w = x_nchw.shape
    x = jnp.transpose(x_nchw, (0, 2, 3, 1)).astype(jnp.bfloat16)
    x = jnp.pad(x, ((0, 0), (pad, pad), (pad, pad), (0, cin_pad - cin)))
    ho = (h + 2 * pad - kh) // stride + 1
    wo = (w + 2 * pad - kw) // stride + 1
    taps = []
    for i in range(kh):
        for j in range(kw):
            taps.append(x[:, i:i + stride * ho:stride, j:j + stride * wo:stride, :])
    patches = jnp.concatenate(taps, axis=-1)          # (N, Ho, Wo, KH*KW*Cin_pad)
    return patches.reshape(n * ho * wo, kh * kw * cin_pad), ho, wo


def _pick_tiles(rows, k_pad, c_pad):
    """Tile sizes from a VMEM byte budget; keep >=2 (even) row tiles for v7x."""
    # K tiling: only split the reduction when the resident K slab gets big
    # (deep layers); keeps large row tiles within v7x's 64 MiB VMEM.
    tile_k, num_k = k_pad, 1
    while tile_k > TILE_K_MAX and tile_k % 256 == 0:
        tile_k //= 2
        num_k *= 2

    # Row tiling: as large as the budget allows (per grid step costs ~0.35 us).
    fixed = 2 * tile_k * c_pad * 2                  # weights, double-buffered bf16
    per_row = (2 * tile_k * 2                       # patches tile, double-buffered bf16
               + 2 * c_pad * 2                      # bf16 y tile, double-buffered
               + c_pad * 4)                         # f32 accumulator scratch
    tile_m = max(SUBLANE, (VMEM_BUDGET_BYTES - fixed) // per_row)
    tile_m = min(TILE_M_MAX, tile_m, _round_up(rows, SUBLANE))
    tile_m = max(SUBLANE, tile_m // SUBLANE * SUBLANE)

    num_m = _cdiv(rows, tile_m)
    if rows > SUBLANE:
        target = max(2, num_m)
        if target % 2:
            target += 1
        if target != num_m:
            tile_m = max(SUBLANE, _round_up(_cdiv(rows, target), SUBLANE))
            num_m = _cdiv(rows, tile_m)
    return tile_m, num_m, tile_k, num_k


def block_forward(x_nchw, conv_w, conv_b, bn_gamma, bn_beta,
                  act='relu', drop=False, norm=True,
                  out_dtype=jnp.bfloat16, channels_last_out=False):
    """Forward pass of `Block`: Conv2d(4,2,1) -> [BatchNorm2d] -> ReLU/LeakyReLU(0.2)."""
    # TODO(synk): drop=True (Dropout(0.5), stochastic training-only path) not implemented.
    assert not drop, "drop=True (Dropout(0.5)) not implemented"
    # TODO(synk): BatchNorm running_mean/running_var state updates are not produced
    # (single training-mode forward semantics only).

    n, cin, h, w = x_nchw.shape
    cout, _, kh, kw = conv_w.shape
    stride, pad = 2, 1

    # Pad input channels so K = KH*KW*Cin_pad is a multiple of 128 -> lane-dense
    # MXU tiles with no extra K-padding copy of the patches matrix.
    cin_pad = cin
    while (kh * kw * cin_pad) % LANE:
        cin_pad += 1
    k_pad = kh * kw * cin_pad
    c_pad = _round_up(cout, LANE)

    # --- im2col in bf16 (single XLA producer) --------------------------------
    # TODO(synk): fully fusing the patch extraction into the Pallas kernel
    # (halo DMA from a padded NHWC bf16 input) would remove this HBM round-trip.
    patches, ho, wo = _im2col_bf16(x_nchw, kh, kw, stride, pad, cin_pad)
    rows = n * ho * wo

    tile_m, num_m, tile_k, num_k = _pick_tiles(rows, k_pad, c_pad)
    rows_pad = num_m * tile_m
    if rows_pad > rows:
        # Zero rows: without a bias add they produce y == 0, so they contribute
        # exactly 0 to the BN sums (no masking needed) and are sliced off later.
        patches = jnp.pad(patches, ((0, rows_pad - rows), (0, 0)))

    # Weights [Cout, Cin, KH, KW] -> [KH*KW*Cin_pad, Cout_pad] matching tap order.
    w_cp = jnp.pad(conv_w, ((0, 0), (0, cin_pad - cin), (0, 0), (0, 0)))
    w2d = jnp.transpose(w_cp, (2, 3, 1, 0)).reshape(k_pad, cout)
    w_p = jnp.pad(w2d, ((0, 0), (0, c_pad - cout))).astype(jnp.bfloat16)

    # --- Pass 1: conv matmul + per-tile BN partial sums ----------------------
    p1_flops = 2 * rows_pad * k_pad * c_pad
    p1_bytes = (rows_pad * k_pad * 2 + num_m * k_pad * c_pad * 2
                + rows_pad * c_pad * 2 + 2 * num_m * c_pad * 4)
    y, sums, sqs = pl.pallas_call(
        _conv_stats_kernel,
        grid=(num_m, num_k),
        in_specs=[
            pl.BlockSpec((tile_m, tile_k), lambda i, k: (i, k)),
            pl.BlockSpec((tile_k, c_pad), lambda i, k: (k, 0)),
        ],
        out_specs=[
            pl.BlockSpec((tile_m, c_pad), lambda i, k: (i, 0)),
            pl.BlockSpec((1, 1, c_pad), lambda i, k: (i, 0, 0)),
            pl.BlockSpec((1, 1, c_pad), lambda i, k: (i, 0, 0)),
        ],
        out_shape=(
            jax.ShapeDtypeStruct((rows_pad, c_pad), jnp.bfloat16),
            jax.ShapeDtypeStruct((num_m, 1, c_pad), jnp.float32),
            jax.ShapeDtypeStruct((num_m, 1, c_pad), jnp.float32),
        ),
        scratch_shapes=[pltpu.VMEM((tile_m, c_pad), jnp.float32)],
        compiler_params=pltpu.CompilerParams(
            dimension_semantics=("parallel", "arbitrary"),
            vmem_limit_bytes=VMEM_LIMIT_BYTES),
        cost_estimate=pl.CostEstimate(flops=p1_flops, transcendentals=0,
                                      bytes_accessed=p1_bytes),
    )(patches, w_p)

    # --- BN finalize: fold batch stats into per-channel scale/shift (tiny) ---
    if norm:
        total = jnp.sum(sums[:, 0, :], axis=0)                    # (c_pad,)
        total_sq = jnp.sum(sqs[:, 0, :], axis=0)
        mean = total / rows
        var = jnp.maximum(total_sq / rows - mean * mean, 0.0)     # clamp cancellation
        gamma_p = jnp.ones((c_pad,), jnp.float32).at[:cout].set(
            bn_gamma.astype(jnp.float32))
        beta_p = jnp.zeros((c_pad,), jnp.float32).at[:cout].set(
            bn_beta.astype(jnp.float32))
        scale = gamma_p * lax.rsqrt(var + BN_EPS)
        shift = beta_p - mean * scale
        # Conv bias intentionally dropped: BN mean subtraction cancels it exactly.
    else:
        scale = jnp.ones((c_pad,), jnp.float32)
        shift = jnp.zeros((c_pad,), jnp.float32).at[:cout].set(
            conv_b.astype(jnp.float32))                           # bias folded here

    # --- Pass 2: scale*y + shift, activation, lane-dense stores --------------
    leaky = 0.0 if act == 'relu' else 0.2
    out_itemsize = jnp.dtype(out_dtype).itemsize
    p2_bytes = rows_pad * c_pad * (2 + out_itemsize) + 2 * c_pad * 4
    out2d = pl.pallas_call(
        functools.partial(_bn_act_kernel, leaky_slope=leaky),
        grid=(num_m,),
        in_specs=[
            pl.BlockSpec((tile_m, c_pad), lambda i: (i, 0)),
            pl.BlockSpec((1, c_pad), lambda i: (0, 0)),
            pl.BlockSpec((1, c_pad), lambda i: (0, 0)),
        ],
        out_specs=pl.BlockSpec((tile_m, c_pad), lambda i: (i, 0)),
        out_shape=jax.ShapeDtypeStruct((rows_pad, c_pad), out_dtype),
        compiler_params=pltpu.CompilerParams(
            dimension_semantics=("parallel",),
            vmem_limit_bytes=VMEM_LIMIT_BYTES),
        cost_estimate=pl.CostEstimate(flops=3 * rows_pad * c_pad, transcendentals=0,
                                      bytes_accessed=p2_bytes),
    )(y, scale.reshape(1, c_pad), shift.reshape(1, c_pad))

    out = out2d[:rows, :cout].reshape(n, ho, wo, cout)
    if channels_last_out:
        return out                     # NHWC: skips a transpose pass when stacking Blocks
    return jnp.transpose(out, (0, 3, 1, 2))   # NCHW, matching the PyTorch module


def _reference(x_nchw, conv_w, conv_b, bn_gamma, bn_beta, act='relu', norm=True):
    """Plain-JAX reference (conv + optional train-mode BN + activation)."""
    y = lax.conv_general_dilated(
        x_nchw, conv_w, window_strides=(2, 2), padding=((1, 1), (1, 1)),
        dimension_numbers=('NCHW', 'OIHW', 'NCHW'))
    y = y + conv_b.reshape(1, -1, 1, 1)
    if norm:
        mean = jnp.mean(y, axis=(0, 2, 3), keepdims=True)
        var = jnp.mean((y - mean) ** 2, axis=(0, 2, 3), keepdims=True)
        y = (y - mean) * lax.rsqrt(var + BN_EPS)
        y = y * bn_gamma.reshape(1, -1, 1, 1) + bn_beta.reshape(1, -1, 1, 1)
    if act == 'relu':
        return jnp.maximum(y, 0.0)
    return jnp.where(y > 0, y, 0.2 * y)


if __name__ == "__main__":
    key = jax.random.PRNGKey(0)
    k_x, k_w, k_b = jax.random.split(key, 3)

    N, Cin, H, W = 2, 4, 16, 16
    Cout, KH, KW = 8, 4, 4

    x = jax.random.normal(k_x, (N, Cin, H, W), dtype=jnp.float32)
    conv_w = jax.random.normal(k_w, (Cout, Cin, KH, KW), dtype=jnp.float32) * 0.1
    conv_b = jax.random.normal(k_b, (Cout,), dtype=jnp.float32) * 0.1
    bn_gamma = 1.0 + 0.1 * jnp.arange(Cout, dtype=jnp.float32)
    bn_beta = 0.05 * jnp.arange(Cout, dtype=jnp.float32)

    # Default module config: Conv -> BatchNorm(train stats) -> ReLU.
    out = jax.block_until_ready(
        block_forward(x, conv_w, conv_b, bn_gamma, bn_beta, act='relu', norm=True))
    ref = jax.block_until_ready(
        _reference(x, conv_w, conv_b, bn_gamma, bn_beta, act='relu', norm=True))
    assert out.shape == (N, Cout, H // 2, W // 2)
    assert out.dtype == jnp.bfloat16
    # bf16 MXU operands + bf16 intermediate/output -> loosened tolerance.
    assert jnp.allclose(out.astype(jnp.float32), ref, rtol=5e-2, atol=5e-2)

    # norm=False / LeakyReLU branch (conv bias folded into the pass-2 shift).
    out2 = jax.block_until_ready(
        block_forward(x, conv_w, conv_b, bn_gamma, bn_beta, act='leaky', norm=False))
    ref2 = jax.block_until_ready(
        _reference(x, conv_w, conv_b, bn_gamma, bn_beta, act='leaky', norm=False))
    assert jnp.allclose(out2.astype(jnp.float32), ref2, rtol=5e-2, atol=5e-2)

    print("KERNEL_OK")
</pallas_src>

<mosaic_0001>
module attributes {stable_mosaic.version = 11 : i64} {
  func.func @_conv_stats_kernel(%arg0: i32, %arg1: i32, %arg2: memref<64x128xbf16, #tpu.memory_space<vmem>>, %arg3: memref<128x128xbf16, #tpu.memory_space<vmem>>, %arg4: memref<64x128xbf16, #tpu.memory_space<vmem>>, %arg5: memref<1x1x128xf32, #tpu.memory_space<vmem>>, %arg6: memref<1x1x128xf32, #tpu.memory_space<vmem>>, %arg7: memref<64x128xf32, #tpu.memory_space<vmem>>) attributes {dimension_semantics = [#tpu.dimension_semantics<parallel>, #tpu.dimension_semantics<arbitrary>], iteration_bounds = array<i64: 2, 1>, scalar_prefetch = 0 : i64, scratch_operands = 1 : i64, tpu.core_type = #tpu.core_type<tc>, window_params = [{transform_indices = @transform_0, window_bounds = array<i64: 64, 128>}, {transform_indices = @transform_1, window_bounds = array<i64: 128, 128>}, {transform_indices = @transform_2, window_bounds = array<i64: 64, 128>}, {transform_indices = @transform_3, window_bounds = array<i64: 1, 1, 128>}, {transform_indices = @transform_4, window_bounds = array<i64: 1, 1, 128>}]} {
    %c0_i32 = arith.constant 0 : i32
    %0 = arith.cmpi eq, %arg1, %c0_i32 : i32
    %1 = arith.extui %0 : i1 to i32
    %c0_i32_0 = arith.constant 0 : i32
    %2 = arith.cmpi ne, %1, %c0_i32_0 : i32
    scf.if %2 {
      %cst_10 = arith.constant 0.000000e+00 : f32
      %12 = vector.broadcast %cst_10 : f32 to vector<64x128xf32>
      %c0_11 = arith.constant 0 : index
      %c0_12 = arith.constant 0 : index
      %13 = vector.load %arg7[%c0_11, %c0_12] : memref<64x128xf32, #tpu.memory_space<vmem>>, vector<64x128xf32>
      tpu.vector_store %arg7[%c0_11, %c0_12], %12 {strides = array<i32>} : memref<64x128xf32, #tpu.memory_space<vmem>>, vector<64x128xf32>,
    } else {
    }
    %c0 = arith.constant 0 : index
    %c0_1 = arith.constant 0 : index
    %3 = vector.load %arg7[%c0, %c0_1] : memref<64x128xf32, #tpu.memory_space<vmem>>, vector<64x128xf32>
    %c0_2 = arith.constant 0 : index
    %c0_3 = arith.constant 0 : index
    %4 = vector.load %arg2[%c0_2, %c0_3] : memref<64x128xbf16, #tpu.memory_space<vmem>>, vector<64x128xbf16>
    %c0_4 = arith.constant 0 : index
    %c0_5 = arith.constant 0 : index
    %5 = vector.load %arg3[%c0_4, %c0_5] : memref<128x128xbf16, #tpu.memory_space<vmem>>, vector<128x128xbf16>
    %cst = arith.constant dense<0.000000e+00> : vector<64x128xf32>
    %6 = tpu.matmul %4, %5, %cst {dimension_numbers = #tpu.dot_dimension_numbers<[1], [0], [0], [1], [0, 0, 1, 1], [], []>} : vector<64x128xbf16>, vector<128x128xbf16>, vector<64x128xf32> -> vector<64x128xf32>
    %7 = arith.addf %3, %6 : vector<64x128xf32>
    %c0_6 = arith.constant 0 : index
    %c0_7 = arith.constant 0 : index
    %8 = vector.load %arg7[%c0_6, %c0_7] : memref<64x128xf32, #tpu.memory_space<vmem>>, vector<64x128xf32>
    tpu.vector_store %arg7[%c0_6, %c0_7], %7 {strides = array<i32>} : memref<64x128xf32, #tpu.memory_space<vmem>>, vector<64x128xf32>,
    %c0_i32_8 = arith.constant 0 : i32
    %9 = arith.cmpi eq, %arg1, %c0_i32_8 : i32
    %10 = arith.extui %9 : i1 to i32
    %c0_i32_9 = arith.constant 0 : i32
    %11 = arith.cmpi ne, %10, %c0_i32_9 : i32
    scf.if %11 {
      %c0_10 = arith.constant 0 : index
      %c0_11 = arith.constant 0 : index
      %12 = vector.load %arg7[%c0_10, %c0_11] : memref<64x128xf32, #tpu.memory_space<vmem>>, vector<64x128xf32>
      %13 = arith.truncf %12 : vector<64x128xf32> to vector<64x128xbf16>
      %c0_12 = arith.constant 0 : index
      %c0_13 = arith.constant 0 : index
      %14 = vector.load %arg4[%c0_12, %c0_13] : memref<64x128xbf16, #tpu.memory_space<vmem>>, vector<64x128xbf16>
      tpu.vector_store %arg4[%c0_12, %c0_13], %13 {strides = array<i32>} : memref<64x128xbf16, #tpu.memory_space<vmem>>, vector<64x128xbf16>,
      %cst_14 = arith.constant dense<0.000000e+00> : vector<128xf32>
      %15 = vector.multi_reduction <add>, %12, %cst_14 [0] : vector<64x128xf32> to vector<128xf32>
      %16 = vector.shape_cast %15 : vector<128xf32> to vector<1x128xf32>
      %17 = arith.mulf %12, %12 : vector<64x128xf32>
      %cst_15 = arith.constant dense<0.000000e+00> : vector<128xf32>
      %18 = vector.multi_reduction <add>, %17, %cst_15 [0] : vector<64x128xf32> to vector<128xf32>
      %19 = vector.shape_cast %18 : vector<128xf32> to vector<1x128xf32>
      %20 = vector.shape_cast %16 : vector<1x128xf32> to vector<1x1x128xf32>
      %c0_16 = arith.constant 0 : index
      %c0_17 = arith.constant 0 : index
      %c0_18 = arith.constant 0 : index
      %21 = vector.load %arg5[%c0_16, %c0_17, %c0_18] : memref<1x1x128xf32, #tpu.memory_space<vmem>>, vector<1x1x128xf32>
      tpu.vector_store %arg5[%c0_16, %c0_17, %c0_18], %20 {strides = array<i32>} : memref<1x1x128xf32, #tpu.memory_space<vmem>>, vector<1x1x128xf32>,
      %22 = vector.shape_cast %19 : vector<1x128xf32> to vector<1x1x128xf32>
      %c0_19 = arith.constant 0 : index
      %c0_20 = arith.constant 0 : index
      %c0_21 = arith.constant 0 : index
      %23 = vector.load %arg6[%c0_19, %c0_20, %c0_21] : memref<1x1x128xf32, #tpu.memory_space<vmem>>, vector<1x1x128xf32>
      tpu.vector_store %arg6[%c0_19, %c0_20, %c0_21], %22 {strides = array<i32>} : memref<1x1x128xf32, #tpu.memory_space<vmem>>, vector<1x1x128xf32>,
    } else {
    }
    return
  }
  func.func @transform_0(%arg0: i32, %arg1: i32) -> (i32, i32) {
    %c0_i32 = arith.constant 0 : i32
    return %arg0, %arg1 : i32, i32
  }
  func.func @transform_1(%arg0: i32, %arg1: i32) -> (i32, i32) {
    %c0_i32 = arith.constant 0 : i32
    %c0_i32_0 = arith.constant 0 : i32
    return %arg1, %c0_i32 : i32, i32
  }
  func.func @transform_2(%arg0: i32, %arg1: i32) -> (i32, i32) {
    %c0_i32 = arith.constant 0 : i32
    %c0_i32_0 = arith.constant 0 : i32
    return %arg0, %c0_i32 : i32, i32
  }
  func.func @transform_3(%arg0: i32, %arg1: i32) -> (i32, i32, i32) {
    %c0_i32 = arith.constant 0 : i32
    %c0_i32_0 = arith.constant 0 : i32
    %c0_i32_1 = arith.constant 0 : i32
    return %arg0, %c0_i32, %c0_i32_0 : i32, i32, i32
  }
  func.func @transform_4(%arg0: i32, %arg1: i32) -> (i32, i32, i32) {
    %c0_i32 = arith.constant 0 : i32
    %c0_i32_0 = arith.constant 0 : i32
    %c0_i32_1 = arith.constant 0 : i32
    return %arg0, %c0_i32, %c0_i32_0 : i32, i32, i32
  }
}

</mosaic_0001>

<bundles_post_ra>
// kernel: tpu_custom_call.1
= control target key start
LH: loop header
LB: loop body
LE: loop exit
PB: predicated region body
PF: predicated region fallthrough
CT: control target
= control target key end

     0   :  { %10 = vsyncpa [#allocation4], 0  ;;  %s1526_s0 = inlined_call_operand.hbm [shape: bf16[128,128], index: 0, kind: input, shape index: {}]   ;;  %s1527_s1 = inlined_call_operand.hbm [shape: bf16[128,128], index: 1, kind: input, shape index: {}]   ;;  %s1528_s2 = inlined_call_operand.hbm [shape: bf16[128,128], index: 2, kind: output, shape index: {0}]   ;;  %s1529_s3 = inlined_call_operand.hbm [shape: f32[2,1,128], index: 3, kind: output, shape index: {1}]   ;;  %s1530_s4 = inlined_call_operand.hbm [shape: f32[2,1,128], index: 4, kind: output, shape index: {2}]  }
   0x1   :  { %12 = vsyncpa [#allocation4 + $0x1], 0 }
   0x2   :  { %13 = vsyncpa [#allocation7], 0 }
   0x3   :  { %14 = vsyncpa [#allocation5], 0 }
   0x4   :  { %16 = vsyncpa [#allocation5 + $0x1], 0 }
   0x5   :  { %17 = vsyncpa [#allocation10], 0 }
   0x6   :  { %19 = vsyncpa [#allocation10 + $0x1], 0  ;;  %s1217_s15 = smov 0   ;;  %s1219_s16 = smov 0  }
   0x7   :  { %s1221_s17 = smov 0   ;;  %s1223_s18 = smov 0  }
   0x8   :  { %s1225_s19 = smov 0   ;;  %s1227_s20 = smov 0  }
   0x9 LB: > { %s1248_s21 = sadd.s32 4294967295, %s1181_s20   ;;  %s1534_s22 = sadd.s32 4294967294, %s1181_s20   ;;  %s1181_s20 = sphi %s1227_s20, %s25_s20   ;;  %s1177_s19 = sphi %s1225_s19, %s1554_s19   ;;  %s1173_s18 = sphi %s1223_s18, %s1553_s18   ;;  %s1169_s17 = sphi %s1221_s17, %s1552_s17   ;;  %s1165_s16 = sphi %s1219_s16, %s1551_s16   ;;  %s1161_s15 = sphi %s1217_s15, %s1550_s15  }
   0xa   : > { %p59_p0 = scmp.ne.s32.totalorder %s1165_s16, %s1161_s15  ;;  %p1531_p1 = scmp.eq.s32.totalorder %s1248_s21, 0 }
   0xb   : > { %p115_p3 = scmp.eq.s32.totalorder %s1534_s22, 1  ;;  %p756_p5 = scmp.ge.s32.totalorder %s1181_s20, 1 }
   0xc   : > { %p1259_p4 = por %p1531_p1, %p59_p0  ;;  %p174_p7 = scmp.lt.s32.totalorder %s1181_s20, 3 }
   0xd   : > { %p1264_p6 = por %p115_p3, %p59_p0  ;;  %s1183_s26 = smov [#allocation6]  }
   0xe   : > { %s1535_s23 = scalar_select %p1259_p4, 1, 0 }
   0xf   : > { %s1536_s24 = scalar_select %p1264_p6, 1, 0 }
  0x10   : > { %p1269_p8 = pnand %p756_p5, %p174_p7  ;;  %s189_s27 = sshll.u32 %s1183_s26, 4  ;;  %s190_s27 = int_to_ptr.vmem [resolvable:$true] %s189_s27 }
  0x11   : > { %s37_s29 = sadd.s32 1, %s1177_s19  ;;  %s977_s6 = scalar_lea.hbm %s1527_s1, 1024 }
  0x12   : > { %s1537_s25 = scalar_select %p1269_p8, 1, 0 }
  0x13   : > { %p890_p9 = pneg %p1269_p8  ;;  %p978_p12 = scmp.ne.s32.totalorder %s1527_s1, %s977_s6 }
  0x14   : > { %p984_p5 = scmp.lt.u32.totalorder %s977_s6, %s1527_s1 }
  0x15   : > { %p1278_p11 = pnand %p890_p9, %p1531_p1 }
  0x17   : > { %p979_p13 = pneg %p1278_p11 }
  0x19   : > { %p980_p0 = pnand %p979_p13, %p978_p12 }
  0x1b   : > { %p981_p3 = pneg %p980_p0 }
  0x1d   : > { %p986_p7 = pnand %p984_p5, %p981_p3 }
  0x1f   : > { %989 = shalt.err (!%p986_p7)
}
  0x20   : > { %s990_s11 = scalar_lea.vmem %s190_s27, 1024  ;;  %p998_p2 = scmp.lt.s32.totalorder %s190_s27, %s190_s27 }
  0x21   : > { %p991_p9 = scmp.ne.s32.totalorder %s190_s27, %s990_s11  ;;  %p999_p6 = scmp.lt.s32.totalorder %s990_s11, %s990_s11 }
  0x23   : > { %p993_p10 = pnand %p991_p9, %p979_p13  ;;  %p1000_p4 = por %p999_p6, %p998_p2 }
  0x25   : > { %p994_p1 = pneg %p993_p10 }
  0x27   : > { %p1001_p8 = pnand %p1000_p4, %p994_p1 }
  0x29   : > { %1004 = shalt.err (!%p1001_p8)
}
  0x2a   : > { %s1184_s12 = smov 64   ;;  %s1185_s13 = smov 4  }
  0x2b   : > { %893 = dma.hbm_to_vmem [thread:$0]  (!%p1278_p11), %s1527_s1, 1024, %s190_s27, [#allocation7], %s1184_s12, %s1184_s12, %s1185_s13  }
  0x2c   : > { %p39_p1 = scmp.ge.s32.totalorder %s37_s29, 2  ;;  %s46_s30 = sadd.s32 1, %s1169_s17 }
  0x2d   : > { %p53_p2 = scmp.ne.s32.totalorder %s1169_s17, %s1165_s16  ;;  %p54_p4 = scmp.eq.s32.totalorder %s1181_s20, 0 }
  0x2e   : > { %s1556_s29 = smov (%p39_p1, %s37_s29), 0  ;;  %p1540_p8 = scmp.eq.s32.totalorder %s1248_s21, 1 }
  0x2f   : > { %p1308_p6 = por %p54_p4, %p53_p2  ;;  %s41_s6 = ssub.s32 %s1177_s19, %s1556_s29 }
  0x30   : > { %p1314_p10 = por %p1540_p8, %p53_p2  ;;  %p909_p12 = scmp.lt.s32.totalorder %s1181_s20, 2 }
  0x31   : > { %p44_p11 = scmp.eq.s32.totalorder %s41_s6, 0  ;;  %s203_s27 = sand.u32 1, %s1169_s17  }
  0x32   : > { %s759_s7 = sshll.u32 %s203_s27, 5  ;;  %s793_s9 = sshll.u32 %s1177_s19, 9 }
  0x33   : > { %s1323_s8 = scalar_select %p44_p11, %s1169_s17, %s46_s30  }
  0x34   : > { %s1329_s14 = scalar_lea.hbm %s1526_s0, %s793_s9  ;;  %s207_s26 = scalar_lea.vmem [#allocation3], %s759_s7 }
  0x35   : > { %s215_s22 = sshll.u32 %s207_s26, 4  ;;  %p1335_p13 = pnand %p909_p12, %p1308_p6  ;;  %s1331_s22 = int_to_ptr.vmem [resolvable:$true] %s215_s22 }
  0x36   : > { %s1339_s30 = scalar_lea.sflag [#allocation4], %s203_s27  ;;  %s1005_s10 = scalar_lea.hbm %s1329_s14, 512 }
  0x37   : > { %p1006_p0 = scmp.ne.s32.totalorder %s1329_s14, %s1005_s10  ;;  %p1007_p3 = pneg %p1335_p13 }
  0x38   : > { %s1010_s5 = scalar_lea.hbm %s1526_s0, 1024  ;;  %p1011_p9 = scmp.lt.u32.totalorder %s1329_s14, %s1526_s0 }
  0x39   : > { %p1008_p5 = pnand %p1007_p3, %p1006_p0  ;;  %p1012_p1 = scmp.lt.u32.totalorder %s1010_s5, %s1005_s10 }
  0x3a   : > { %p1014_p4 = scmp.lt.u32.totalorder %s1005_s10, %s1329_s14 }
  0x3b   : > { %p1009_p7 = pneg %p1008_p5  ;;  %p1013_p2 = por %p1012_p1, %p1011_p9 }
  0x3d   : > { %p1015_p6 = por %p1014_p4, %p1013_p2 }
  0x3f   : > { %p1016_p8 = pnand %p1015_p6, %p1009_p7 }
  0x41   : > { %1019 = shalt.err (!%p1016_p8)
}
  0x42   : > { %s1020_s27 = scalar_lea.vmem %s1331_s22, 512  ;;  %s1186_s7 = smov [#allocation3]  }
  0x43   : > { %p1021_p12 = scmp.ne.s32.totalorder %s1331_s22, %s1020_s27  ;;  %s1025_s9 = sshll.u32 %s1186_s7, 4  ;;  %s1026_s9 = int_to_ptr.vmem [resolvable:$false] %s1025_s9 }
  0x44   : > { %s1027_s11 = scalar_lea.vmem %s1026_s9, 1024  ;;  %p1028_p5 = scmp.lt.s32.totalorder %s1331_s22, %s1026_s9 }
  0x45   : > { %p1023_p11 = pnand %p1021_p12, %p1007_p3  ;;  %p1029_p9 = scmp.lt.s32.totalorder %s1027_s11, %s1020_s27 }
  0x47   : > { %p1024_p0 = pneg %p1023_p11  ;;  %p1030_p1 = por %p1029_p9, %p1028_p5 }
  0x49   : > { %p1031_p2 = pnand %p1030_p1, %p1024_p0 }
  0x4b   : > { %1034 = shalt.err (!%p1031_p2)
}
  0x4c   : > { %897 = dma.hbm_to_vmem [thread:$0]  (!%p1335_p13), %s1329_s14, 512, %s1331_s22, %s1339_s30, %s1184_s12, %s1184_s12, %s1185_s13  }
  0x4d   : > { %p1543_p3 = scmp.ne.s32.totalorder %s1537_s25, 0 }
  0x4e   : > { %s1373_s10 = sand.u32 (!%p1543_p3), 1, %s1165_s16   ;;  %p1544_p7 = scmp.ne.s32.totalorder (!%p1543_p3), %s1535_s23, 0 }
  0x4f   : > { %227 = sbr.rel (%p1543_p3) target bundleno = 411 (0x19b), region = 28  ;;  %s763_s5 = sshll.u32 (!%p1543_p3), %s1373_s10, 5 }
  0x50   : > { %s230_s26 = scalar_lea.sflag (!%p1543_p3), [#allocation4], %s1373_s10  ;;  %s1379_s6 = scalar_lea.vmem (!%p1543_p3), [#allocation3], %s763_s5 }
  0x56   : > { %1144 = dma.done.wait (%p1544_p7), %s230_s26, 512  }
  0x57   : > { %1146 = vsyncadd (%p1544_p7), %s230_s26, 4294966784  ;;  %p1545_p13 = scmp.eq.s32.totalorder %s1248_s21, 0 }
  0x59   : > { %1148 = dma.done.wait (%p1545_p13), [#allocation7], 1024   ;;  %p1546_p4 = pmov %p1545_p13 }
  0x5a   : > { %v965_v0 = vld [vmem:[#allocation6] sm:$0xff]   ;;  %v966_v1 = vld [vmem:[#allocation6 + $0x8] sm:$0xff]   ;;  %v967_v2 = vld [vmem:[#allocation6 + $0x10] sm:$0xff]   ;;  %s257_s22 = scalar_lea.vmem [#allocation8], %s763_s5  ;;  %s802_s25 = sshll.u32 %s1173_s18, 9 }
  0x5b   : > { %1150 = vsyncadd (%p1546_p4), [#allocation7], 4294966272  ;;  %838 = vmatprep.subr.bf16.mxu0 %v965_v0  ;;  %862 = vmatprep.subr.bf16.mxu1 %v965_v0  ;;  %v968_v3 = vld [vmem:[#allocation6 + $0x18] sm:$0xff]   ;;  %v973_v4 = vld [vmem:[%s1379_s6] sm:$0xff]   ;;  %s580_s23 = sshll.u32 %s257_s22, 4  ;;  %s1404_s14 = scalar_lea.hbm %s1528_s2, %s802_s25  ;;  %s1398_s23 = int_to_ptr.vmem [resolvable:$true] %s580_s23 }
  0x5c   : > { %839 = vmatpush3.bf16.msra.mxu0 %v965_v0  ;;  %870 = vmatpush3.bf16.msra.mxu1 %v965_v0  ;;  %v975_v5 = vld [vmem:[%s1379_s6 + $0x10] sm:$0xff]   ;;  %v969_v6 = vld [vmem:[#allocation6 + $0x20] sm:$0xff]   ;;  %v970_v7 = vld [vmem:[#allocation6 + $0x28] sm:$0xff]   ;;  %s559_s30 = scalar_lea.sflag [#allocation5], %s1373_s10  ;;  %s1035_s27 = scalar_lea.vmem %s1398_s23, 512 }
  0x5d   : > { %840 = vmatprep.subr.bf16.mxu0 %v966_v1  ;;  %863 = vmatprep.subr.bf16.mxu1 %v966_v1  ;;  %v971_v8 = vld [vmem:[#allocation6 + $0x30] sm:$0xff]   ;;  %v972_v9 = vld [vmem:[#allocation6 + $0x38] sm:$0xff]   ;;  %v974_v10 = vld [vmem:[%s1379_s6 + $0x8] sm:$0xff]   ;;  %p1036_p6 = scmp.ne.s32.totalorder %s1398_s23, %s1035_s27  ;;  %s1187_s7 = smov [#allocation8]  }
  0x5e   : > { %854 = vmatprep.mubr.bf16.mxu0 %v973_v4  ;;  %858 = vmatprep.mubr.bf16.mxu1 %v975_v5  ;;  %v976_v11 = vld [vmem:[%s1379_s6 + $0x18] sm:$0xff]   ;;  %s1039_s9 = sshll.u32 %s1187_s7, 4  ;;  %s1040_s9 = int_to_ptr.vmem [resolvable:$false] %s1039_s9 }
  0x5f   : > { %p1037_p8 = pnand %p1036_p6, %p1314_p10  ;;  %s1041_s11 = scalar_lea.vmem %s1040_s9, 1024 }
  0x60   : > { %841 = vmatpush3.bf16.msra.mxu0 %v966_v1  ;;  %871 = vmatpush3.bf16.msra.mxu1 %v966_v1  ;;  %p1042_p11 = scmp.lt.s32.totalorder %s1398_s23, %s1040_s9  ;;  %p1043_p0 = scmp.lt.s32.totalorder %s1041_s11, %s1035_s27 }
  0x61   : > { %842 = vmatprep.subr.bf16.mxu0 %v967_v2  ;;  %864 = vmatprep.subr.bf16.mxu1 %v967_v2  ;;  %p1038_p12 = pneg %p1037_p8 }
  0x62   : > { %p1044_p5 = por %p1043_p0, %p1042_p11 }
  0x64   : > { %843 = vmatpush3.bf16.msra.mxu0 %v967_v2  ;;  %872 = vmatpush3.bf16.msra.mxu1 %v967_v2  ;;  %p1045_p9 = pnand %p1044_p5, %p1038_p12 }
  0x65   : > { %844 = vmatprep.subr.bf16.mxu0 %v968_v3  ;;  %865 = vmatprep.subr.bf16.mxu1 %v968_v3 }
  0x68   : > { %845 = vmatpush3.bf16.msra.mxu0 %v968_v3  ;;  %873 = vmatpush3.bf16.msra.mxu1 %v968_v3 }
  0x69   : > { %846 = vmatprep.subr.bf16.mxu0 %v969_v6  ;;  %866 = vmatprep.subr.bf16.mxu1 %v969_v6 }
  0x6c   : > { %847 = vmatpush3.bf16.msra.mxu0 %v969_v6  ;;  %874 = vmatpush3.bf16.msra.mxu1 %v969_v6 }
  0x6d   : > { %848 = vmatprep.subr.bf16.mxu0 %v970_v7  ;;  %867 = vmatprep.subr.bf16.mxu1 %v970_v7 }
  0x70   : > { %849 = vmatpush3.bf16.msra.mxu0 %v970_v7  ;;  %875 = vmatpush3.bf16.msra.mxu1 %v970_v7 }
  0x71   : > { %850 = vmatprep.subr.bf16.mxu0 %v971_v8  ;;  %868 = vmatprep.subr.bf16.mxu1 %v971_v8 }
  0x74   : > { %851 = vmatpush3.bf16.msra.mxu0 %v971_v8  ;;  %876 = vmatpush3.bf16.msra.mxu1 %v971_v8 }
  0x75   : > { %852 = vmatprep.subr.bf16.mxu0 %v972_v9  ;;  %869 = vmatprep.subr.bf16.mxu1 %v972_v9 }
  0x78   : > { %853 = vmatpush3.bf16.msra.mxu0 %v972_v9  ;;  %877 = vmatpush3.bf16.msra.mxu1 %v972_v9 }
  0x7b   : > { %855 = vmatmul.mubr.bf16.vlgmr.msra.gmra.mrb[0].mxu0 %v974_v10  ;;  %859 = vmatmul.mubr.bf16.vlgmr.msra.gmra.mrb[0].mxu1 %v976_v11 }
 0x14e   : > { %v856_v12 = vpop.f32.mrb[0].mxu0  ;;  %v1395_v13 = vpop.f32.mrb[0].mxu1 }
 0x14f   : > { %v424_v14 = vpop.f32.mrb[1].mxu0  ;;  %v440_v15 = vpop.f32.mrb[1].mxu1  ;;  %v537_v27 = vmul.f32 %v856_v12, %v856_v12 }
 0x150   : > { %v857_v16 = vpop.f32.mrb[2].mxu0  ;;  %v861_v17 = vpop.f32.mrb[2].mxu1  ;;  %v535_v18 = vmul.f32 %v424_v14, %v424_v14 }
 0x151   : > { %v811_v19 = vpack.c.bf16 %v857_v16, %v856_v12  ;;  %v427_v20 = vpop.f32.mrb[3].mxu0  ;;  %v821_v21 = vpack.c.bf16 %v861_v17, %v1395_v13  ;;  %v443_v22 = vpop.f32.mrb[3].mxu1 }
 0x152   : > { %v806_v23 = vpack.c.bf16 %v427_v20, %v424_v14  ;;  %v522_v24 = vadd.f32 %v427_v20, %v424_v14  ;;  %v536_v25 = vmul.f32 %v427_v20, %v427_v20  ;;  %v816_v26 = vpack.c.bf16 %v443_v22, %v440_v15 }
 0x153   : > { %823 = vst [vmem:[%s257_s22 + $0x8] sm:$0xff] %v811_v19   ;;  %825 = vst [vmem:[%s257_s22 + $0x18] sm:$0xff] %v821_v21  }
 0x154   : > { %807 = vst [vmem:[%s257_s22] sm:$0xff] %v806_v23   ;;  %v523_v28 = vadd.f32 %v856_v12, %v522_v24  ;;  %v543_v29 = vadd.f32 %v536_v25, %v535_v18  ;;  %824 = vst [vmem:[%s257_s22 + $0x10] sm:$0xff] %v816_v26  }
 0x155   : > { %1048 = shalt.err (!%p1045_p9)
}
 0x156   : > { %s1049_s5 = scalar_lea.hbm %s1404_s14, 512  ;;  %s1053_s22 = scalar_lea.hbm %s1528_s2, 1024 }
 0x157   : > { %p1050_p1 = scmp.ne.s32.totalorder %s1404_s14, %s1049_s5  ;;  %p1054_p7 = scmp.lt.u32.totalorder %s1404_s14, %s1528_s2 }
 0x158   : > { %p1055_p13 = scmp.lt.u32.totalorder %s1053_s22, %s1049_s5  ;;  %p1057_p6 = scmp.lt.u32.totalorder %s1049_s5, %s1404_s14 }
 0x159   : > { %p1051_p2 = pnand %p1050_p1, %p1314_p10 }
 0x15a   : > { %p1056_p4 = por %p1055_p13, %p1054_p7 }
 0x15b   : > { %p1052_p3 = pneg %p1051_p2 }
 0x15c   : > { %p1058_p8 = por %p1057_p6, %p1056_p4 }
 0x15e   : > { %p1059_p12 = pnand %p1058_p8, %p1052_p3 }
 0x160   : > { %1062 = shalt.err (!%p1059_p12)
}
 0x161   : > { %s1188_s13 = smov 64   ;;  %s1189_s27 = smov 4   ;;  %v538_v30 = vmul.f32 %v857_v16, %v857_v16  ;;  %v544_v31 = vadd.f32 %v543_v29, %v537_v27  ;;  %v524_v32 = vadd.f32 %v857_v16, %v523_v28  ;;  %v539_v33 = vmul.f32 %v440_v15, %v440_v15 }
 0x162   : > { %884 = dma.vmem_to_hbm [thread:$0]  (%p1314_p10), %s1398_s23, 512, %s1404_s14, %s559_s30, %s1188_s13, %s1188_s13, %s1189_s27   ;;  %v540_v38 = vmul.f32 %v443_v22, %v443_v22  ;;  %v541_v39 = vmul.f32 %v1395_v13, %v1395_v13  ;;  %v542_v42 = vmul.f32 %v861_v17, %v861_v17 }
 0x163   : > { %v525_v34 = vadd.f32 %v524_v32, %v440_v15  ;;  %v545_v35 = vadd.f32 %v544_v31, %v538_v30  ;;  %s563_s23 = sand.u32 1, %s1248_s21   ;;  %s789_s14 = sshll.u32 %s1173_s18, 4 }
 0x164   : > { %s263_s30 = scalar_lea.vmem [#allocation9], %s1373_s10  ;;  %s269_s9 = scalar_lea.vmem [#allocation11], %s1373_s10 }
 0x165   : > { %v546_v36 = vadd.f32 %v545_v35, %v539_v33  ;;  %v526_v37 = vadd.f32 %v525_v34, %v443_v22  ;;  %s596_s7 = sshll.u32 %s263_s30, 4  ;;  %s609_s11 = sshll.u32 %s269_s9, 4  ;;  %s1444_s7 = int_to_ptr.vmem [resolvable:$true] %s596_s7  ;;  %s1451_s11 = int_to_ptr.vmem [resolvable:$true] %s609_s11 }
 0x166   : > { %s1442_s6 = scalar_lea.hbm %s1529_s3, %s789_s14  ;;  %s1449_s22 = scalar_lea.hbm %s1530_s4, %s789_s14 }
 0x167   : > { %v527_v40 = vadd.f32 %v1395_v13, %v526_v37  ;;  %v547_v41 = vadd.f32 %v546_v36, %v540_v38  ;;  %s1453_s25 = scalar_lea.sflag [#allocation10], %s563_s23  ;;  %s1063_s12 = scalar_lea.vmem %s1444_s7, 16 }
 0x168   : > { %p1064_p11 = scmp.ne.s32.totalorder %s1444_s7, %s1063_s12  ;;  %s1190_s13 = smov [#allocation9]  }
 0x169   : > { %v528_v43 = vadd.f32 %v861_v17, %v527_v40  ;;  %v548_v44 = vadd.f32 %v547_v41, %v541_v39  ;;  %s1067_s27 = sshll.u32 %s1190_s13, 4  ;;  %s1068_s27 = int_to_ptr.vmem [resolvable:$false] %s1067_s27 }
 0x16a   : > { %p1065_p0 = pnand %p1064_p11, %p1314_p10  ;;  %s1069_s5 = scalar_lea.vmem %s1068_s27, 32 }
 0x16b   : > { %v529_v45 = vrot.slane %v528_v43, 4  ;;  %v549_v46 = vadd.f32 %v548_v44, %v542_v42  ;;  %p1070_p9 = scmp.lt.s32.totalorder %s1444_s7, %s1068_s27  ;;  %p1071_p1 = scmp.lt.s32.totalorder %s1069_s5, %s1063_s12 }
 0x16c   : > { %p1066_p5 = pneg %p1065_p0 }
 0x16d   : > { %v530_v47 = vadd.f32 %v529_v45, %v528_v43  ;;  %v550_v48 = vrot.slane %v549_v46, 4  ;;  %p1072_p2 = por %p1071_p1, %p1070_p9 }
 0x16f   : > { %v531_v49 = vrot.slane %v530_v47, 2  ;;  %v551_v50 = vadd.f32 %v550_v48, %v549_v46  ;;  %p1073_p3 = pnand %p1072_p2, %p1066_p5 }
 0x171   : > { %v532_v51 = vadd.f32 %v531_v49, %v530_v47  ;;  %v552_v52 = vrot.slane %v551_v50, 2 }
 0x173   : > { %v533_v53 = vrot.slane %v532_v51, 1  ;;  %v553_v54 = vadd.f32 %v552_v52, %v551_v50 }
 0x175   : > { %v554_v55 = vrot.slane %v553_v54, 1  ;;  %v534_v56 = vadd.f32 %v533_v53, %v532_v51 }
 0x177   : > { %556 = vst [vmem:[%s263_s30] sm:$0x1] %v534_v56  ;;  %v555_v57 = vadd.f32 %v554_v55, %v553_v54 }
 0x178   : > { %1076 = shalt.err (!%p1073_p3)
}
 0x179   : > { %s1077_s23 = scalar_lea.hbm %s1442_s6, 16  ;;  %s1081_s26 = scalar_lea.hbm %s1529_s3, 32 }
 0x17a   : > { %p1078_p7 = scmp.ne.s32.totalorder %s1442_s6, %s1077_s23  ;;  %p1082_p6 = scmp.lt.u32.totalorder %s1442_s6, %s1529_s3 }
 0x17b   : > { %p1083_p8 = scmp.lt.u32.totalorder %s1081_s26, %s1077_s23  ;;  %p1085_p11 = scmp.lt.u32.totalorder %s1077_s23, %s1442_s6 }
 0x17c   : > { %p1079_p13 = pnand %p1078_p7, %p1314_p10 }
 0x17d   : > { %p1084_p12 = por %p1083_p8, %p1082_p6 }
 0x17e   : > { %p1080_p4 = pneg %p1079_p13 }
 0x17f   : > { %p1086_p0 = por %p1085_p11, %p1084_p12 }
 0x181   : > { %p1087_p5 = pnand %p1086_p0, %p1080_p4 }
 0x183   : > { %1090 = shalt.err (!%p1087_p5)
}
 0x184   : > { %885 = dma.vmem_to_hbm [thread:$0]  (%p1314_p10), %s1444_s7, 16, %s1442_s6, %s1453_s25   ;;  %557 = vst [vmem:[%s269_s9] sm:$0x1] %v555_v57 }
 0x185   : > { %s1091_s12 = scalar_lea.vmem %s1451_s11, 16  ;;  %s1191_s13 = smov [#allocation11]  }
 0x186   : > { %p1092_p9 = scmp.ne.s32.totalorder %s1451_s11, %s1091_s12  ;;  %s1095_s27 = sshll.u32 %s1191_s13, 4  ;;  %s1096_s27 = int_to_ptr.vmem [resolvable:$false] %s1095_s27 }
 0x187   : > { %s1097_s5 = scalar_lea.vmem %s1096_s27, 32  ;;  %p1098_p3 = scmp.lt.s32.totalorder %s1451_s11, %s1096_s27 }
 0x188   : > { %p1093_p1 = pnand %p1092_p9, %p1314_p10  ;;  %p1099_p7 = scmp.lt.s32.totalorder %s1097_s5, %s1091_s12 }
 0x18a   : > { %p1094_p2 = pneg %p1093_p1  ;;  %p1100_p13 = por %p1099_p7, %p1098_p3 }
 0x18c   : > { %p1101_p4 = pnand %p1100_p13, %p1094_p2 }
 0x18e   : > { %1104 = shalt.err (!%p1101_p4)
}
 0x18f   : > { %s1105_s10 = scalar_lea.hbm %s1449_s22, 16  ;;  %s1109_s6 = scalar_lea.hbm %s1530_s4, 32 }
 0x190   : > { %p1106_p6 = scmp.ne.s32.totalorder %s1449_s22, %s1105_s10  ;;  %p1110_p11 = scmp.lt.u32.totalorder %s1449_s22, %s1530_s4 }
 0x191   : > { %p1111_p0 = scmp.lt.u32.totalorder %s1109_s6, %s1105_s10  ;;  %p1113_p9 = scmp.lt.u32.totalorder %s1105_s10, %s1449_s22 }
 0x192   : > { %p1107_p8 = pnand %p1106_p6, %p1314_p10 }
 0x193   : > { %p1112_p5 = por %p1111_p0, %p1110_p11 }
 0x194   : > { %p1108_p12 = pneg %p1107_p8 }
 0x195   : > { %p1114_p1 = por %p1113_p9, %p1112_p5 }
 0x197   : > { %p1115_p2 = pnand %p1114_p1, %p1108_p12 }
 0x199   : > { %1118 = shalt.err (!%p1115_p2)
}
 0x19a   : > { %886 = dma.vmem_to_hbm [thread:$0]  (%p1314_p10), %s1451_s11, 16, %s1449_s22, %s1453_s25  }
 0x19b PF: > { %s621_s30 = sand.u32 1, %s1161_s15   ;;  %p1547_p3 = scmp.ne.s32.totalorder %s1536_s24, 0 }
 0x19c   : > { %p1548_p7 = scmp.ge.s32.totalorder %s1181_s20, 2  ;;  %s622_s26 = scalar_lea.sflag [#allocation5], %s621_s30 }
 0x19e   : > { %p899_p13 = pnand %p1548_p7, %p1547_p3 }
 0x1a0   : > { %1152 = dma.done.wait (!%p899_p13), %s622_s26, 512  }
 0x1a1   : > { %1154 = vsyncadd (!%p899_p13), %s622_s26, 4294966784  ;;  %s1549_s18 = sadd.s32 4294967294, %s1181_s20  }
 0x1a2   : > { %s630_s21 = sand.u32 1, %s1549_s18  }
 0x1a3   : > { %s631_s12 = scalar_lea.sflag [#allocation10], %s630_s21 }
 0x1a4   : > { %1156 = dma.done.wait (!%p899_p13), %s631_s12, 32  }
 0x1a5   : > { %1158 = vsyncadd (!%p899_p13), %s631_s12, 4294967264  ;;  %s25_s20 = sadd.s32 1, %s1181_s20   ;;  %s1550_s15 = smov %s1165_s16 }
 0x1a6   : > { %p22_p10 = scmp.ge.s32.totalorder %s25_s20, 4   ;;  %s1551_s16 = smov %s1169_s17 }
 0x1a7   : > { %s1552_s17 = smov %s1323_s8  ;;  %s1553_s18 = smov %s1177_s19 }
 0x1a8   : > { %s1554_s19 = smov %s1556_s29  ;;  %24 = sbr.rel (!%p22_p10) target bundleno = 9 (0x9), region = 118 }
 0x1af   :  { %643 = vsyncpa [#allocation4], 1 }
 0x1b0   :  { %645 = vsyncpa [#allocation4 + $0x1], 1 }
 0x1b1   :  { %646 = vsyncpa [#allocation7], 1 }
 0x1b2   :  { %647 = vsyncpa [#allocation5], 1 }
 0x1b3   :  { %649 = vsyncpa [#allocation5 + $0x1], 1 }
 0x1b4   :  { %650 = vsyncpa [#allocation10], 1 }
 0x1b5   :  { %652 = vsyncpa [#allocation10 + $0x1], 1 }

</bundles_post_ra>
